<compile_context>
chip_gen: v6e
topology: v6e:2x2x1
jax: 0.10.0
libtpu: 0.0.40
codegen_flags: <defaults>
</compile_context>

<pallas_src>
import functools

import jax
import jax.numpy as jnp
from jax import lax
from jax.experimental import pallas as pl
from jax.experimental.pallas import tpu as pltpu


def _meanstd_kernel(x_ref, mean_ref, std_ref, *acc_refs, n_total, bn, nb,
                    single_block):
    inv_nm1 = (1.0 / (n_total - 1)) if n_total > 1 else float("nan")

    if single_block:
        # Whole batch resident in this block: numerically-nice two-pass form.
        x = x_ref[...].astype(jnp.float32)
        mean = jnp.sum(x, axis=0, keepdims=True) * (1.0 / n_total)
        d = x - mean
        var = jnp.sum(d * d, axis=0, keepdims=True) * inv_nm1
        mean_ref[...] = mean
        std_ref[...] = jnp.sqrt(var)
        return

    mean_acc, m2_acc = acc_refs
    b = pl.program_id(1)
    rem = n_total - (nb - 1) * bn          # rows in the last (ragged?) block

    @pl.when(b == 0)
    def _():
        mean_acc[...] = jnp.zeros_like(mean_acc)
        m2_acc[...] = jnp.zeros_like(m2_acc)

    x = x_ref[...].astype(jnp.float32)

    def combine(block_sum, block_m2_of_mean, n_b):
        # Chan's parallel (mean, M2) combine; also correct for n_a == 0.
        n_a = (b * bn).astype(jnp.float32)
        frac = n_b / (n_a + n_b)
        block_mean = block_sum * (1.0 / n_b)
        block_m2 = block_m2_of_mean(block_mean)
        delta = block_mean - mean_acc[...]
        mean_acc[...] = mean_acc[...] + delta * frac
        m2_acc[...] = m2_acc[...] + block_m2 + (delta * delta) * (n_a * frac)

    def full_block():
        combine(jnp.sum(x, axis=0, keepdims=True),
                lambda m: jnp.sum((x - m) * (x - m), axis=0, keepdims=True),
                float(bn))

    if rem == bn:
        # N % bn == 0: every block is full; unmasked hot path everywhere.
        full_block()
    else:
        @pl.when(b < nb - 1)
        def _():
            full_block()

        @pl.when(b == nb - 1)
        def _():
            # Ragged last block: mask padded rows with a cheap (bn, 1) iota.
            row_ok = lax.broadcasted_iota(jnp.int32, (bn, 1), 0) < rem
            combine(
                jnp.sum(jnp.where(row_ok, x, 0.0), axis=0, keepdims=True),
                lambda m: jnp.sum(jnp.where(row_ok, (x - m) * (x - m), 0.0),
                                  axis=0, keepdims=True),
                float(rem))

    @pl.when(b == nb - 1)
    def _():
        mean_ref[...] = mean_acc[...]
        std_ref[...] = jnp.sqrt(m2_acc[...] * inv_nm1)  # M2 >= 0, no clamp needed


def _vmem_capacity_bytes():
    """Physical VMEM of the attached TPU; conservative (v7x-sized) fallback."""
    try:
        return int(pltpu.get_tpu_info().vmem_capacity_bytes)
    except Exception:
        return 64 * 1024 * 1024


def _choose_tiling(N, F, itemsize, block_budget, two_core_hint):
    """Pick (bn, nb, tile, nf) for the (N, F) slab.  No padding is ever used."""
    if N * F * itemsize <= block_budget:
        # Whole array in one block: single grid step, two-pass kernel.
        bn, nb, tile, nf = N, 1, F, 1
    elif 8 * F * itemsize <= block_budget:
        # Full-width rows fit: tile the batch axis only (contiguous row DMAs).
        tile, nf = F, 1
        bn = min((block_budget // (F * itemsize)) // 8 * 8, (N // 8) * 8)
        bn = max(bn, 8)
        nb = pl.cdiv(N, bn)
    else:
        # Rows wider than the block budget: tile the feature axis too.
        bn = N if N < 8 else 8
        nb = pl.cdiv(N, bn)
        max_tile = max(128, (block_budget // (bn * itemsize)) // 128 * 128)
        if F <= max_tile:
            tile, nf = F, 1
        else:
            nf = pl.cdiv(pl.cdiv(F, 128), max_tile // 128)
            tile = 128 * pl.cdiv(pl.cdiv(F, 128), nf)

    # On 2-TensorCore chips, give the "parallel" feature axis >= 2 steps when
    # there is real work (multiple batch blocks) and chunks stay wide.
    if two_core_hint and nf == 1 and nb > 1 and F >= 2048:
        nf = 2
        tile = 128 * pl.cdiv(pl.cdiv(F, 128), 2)
    return bn, nb, tile, nf


def mean_std_forward(x, *, _block_budget_override=None):
    """MeanStd.forward: returns (x, mean over dim 0, unbiased std over dim 0)."""
    N = int(x.shape[0])
    feat_shape = tuple(int(d) for d in x.shape[1:])
    F = 1
    for d in feat_shape:
        F *= d
    itemsize = jnp.dtype(x.dtype).itemsize

    vmem_cap = _vmem_capacity_bytes()
    if vmem_cap >= 96 * 1024 * 1024:        # v5e / v6e: 128 MiB VMEM, 1 TC
        block_budget = 16 * 1024 * 1024
        vmem_limit = 96 * 1024 * 1024
        two_core_hint = False
    else:                                   # v7x-like: 64 MiB VMEM, 2 TCs
        block_budget = 8 * 1024 * 1024
        vmem_limit = 48 * 1024 * 1024
        two_core_hint = True
    if _block_budget_override is not None:  # test hook: force blocked-batch path
        block_budget = int(_block_budget_override)

    bn, nb, tile, nf = _choose_tiling(N, F, itemsize, block_budget, two_core_hint)
    single_block = nb == 1

    x2d = x.reshape(N, F)                   # lane-dense view; no padding copy

    kernel = functools.partial(_meanstd_kernel, n_total=N, bn=bn, nb=nb,
                               single_block=single_block)

    # f32 (mean, M2) accumulators only needed when the batch is blocked.
    scratch = [] if single_block else [pltpu.VMEM((1, tile), jnp.float32),
                                       pltpu.VMEM((1, tile), jnp.float32)]

    cost = pl.CostEstimate(
        flops=4 * N * F,
        transcendentals=0,
        bytes_accessed=N * F * itemsize + 2 * F * 4,
    )

    mean2d, std2d = pl.pallas_call(
        kernel,
        out_shape=(
            jax.ShapeDtypeStruct((1, F), jnp.float32),
            jax.ShapeDtypeStruct((1, F), jnp.float32),
        ),
        grid_spec=pltpu.PrefetchScalarGridSpec(
            num_scalar_prefetch=0,
            grid=(nf, nb),                  # batch (reduction) axis last
            in_specs=[pl.BlockSpec((bn, tile), lambda f, b: (b, f))],
            out_specs=(
                pl.BlockSpec((1, tile), lambda f, b: (0, f)),
                pl.BlockSpec((1, tile), lambda f, b: (0, f)),
            ),
            scratch_shapes=scratch,
        ),
        compiler_params=pltpu.CompilerParams(
            dimension_semantics=("parallel", "arbitrary"),
            vmem_limit_bytes=vmem_limit,
        ),
        cost_estimate=cost,
    )(x2d)

    mean = mean2d[0].reshape(feat_shape)
    std = std2d[0].reshape(feat_shape)
    # Identity pass-through with zero extra HBM traffic: return the original x.
    return x, mean, std


if __name__ == "__main__":
    key = jax.random.PRNGKey(0)
    x = jax.random.normal(key, (2, 4, 16, 16), dtype=jnp.float32)   # NCHW

    y, mean, std = mean_std_forward(x)
    jax.block_until_ready((y, mean, std))

    # Mimic the module's behavior: print mean/std over dim=0, return x.
    print("\nmean\n", mean)
    print("\nstd\n", std)

    ref_mean = jnp.mean(x, axis=0)
    ref_std = jnp.std(x, axis=0, ddof=1)        # PyTorch std default is unbiased
    assert y is x                                # zero-copy identity pass-through
    assert jnp.allclose(mean, ref_mean, atol=1e-5, rtol=1e-5)
    assert jnp.allclose(std, ref_std, atol=1e-5, rtol=1e-5)

    # Exercise the blocked-batch reduction paths with a tiny forced block
    # budget: unmasked (N % bn == 0) and masked (ragged last block) cases.
    for n in (48, 50):
        xb = jax.random.normal(jax.random.PRNGKey(1), (n, 4, 16, 16),
                               dtype=jnp.float32)
        _, mb, sb = mean_std_forward(xb, _block_budget_override=64 * 1024)
        jax.block_until_ready((mb, sb))
        assert jnp.allclose(mb, jnp.mean(xb, axis=0), atol=1e-5, rtol=1e-5)
        assert jnp.allclose(sb, jnp.std(xb, axis=0, ddof=1), atol=1e-5, rtol=1e-5)

    print("KERNEL_OK")
</pallas_src>

<mosaic_0001>
module attributes {stable_mosaic.version = 11 : i64} {
  func.func @_meanstd_kernel(%arg0: i32, %arg1: i32, %arg2: memref<2x1024xf32, #tpu.memory_space<vmem>>, %arg3: memref<1x1024xf32, #tpu.memory_space<vmem>>, %arg4: memref<1x1024xf32, #tpu.memory_space<vmem>>) attributes {dimension_semantics = [#tpu.dimension_semantics<parallel>, #tpu.dimension_semantics<arbitrary>], iteration_bounds = array<i64: 1, 1>, scalar_prefetch = 0 : i64, scratch_operands = 0 : i64, tpu.core_type = #tpu.core_type<tc>, window_params = [{transform_indices = @transform_0, window_bounds = array<i64: 2, 1024>}, {transform_indices = @transform_1, window_bounds = array<i64: 1, 1024>}, {transform_indices = @transform_2, window_bounds = array<i64: 1, 1024>}]} {
    %c0 = arith.constant 0 : index
    %c0_0 = arith.constant 0 : index
    %0 = vector.load %arg2[%c0, %c0_0] : memref<2x1024xf32, #tpu.memory_space<vmem>>, vector<2x1024xf32>
    %cst = arith.constant dense<0.000000e+00> : vector<1024xf32>
    %1 = vector.multi_reduction <add>, %0, %cst [0] : vector<2x1024xf32> to vector<1024xf32>
    %2 = vector.shape_cast %1 : vector<1024xf32> to vector<1x1024xf32>
    %cst_1 = arith.constant 5.000000e-01 : f32
    %3 = vector.broadcast %cst_1 : f32 to vector<1x1024xf32>
    %4 = arith.mulf %2, %3 : vector<1x1024xf32>
    %5 = vector.broadcast %4 : vector<1x1024xf32> to vector<2x1024xf32>
    %6 = arith.subf %0, %5 : vector<2x1024xf32>
    %7 = arith.mulf %6, %6 : vector<2x1024xf32>
    %cst_2 = arith.constant dense<0.000000e+00> : vector<1024xf32>
    %8 = vector.multi_reduction <add>, %7, %cst_2 [0] : vector<2x1024xf32> to vector<1024xf32>
    %9 = vector.shape_cast %8 : vector<1024xf32> to vector<1x1024xf32>
    %cst_3 = arith.constant 1.000000e+00 : f32
    %10 = vector.broadcast %cst_3 : f32 to vector<1x1024xf32>
    %11 = arith.mulf %9, %10 : vector<1x1024xf32>
    %c0_4 = arith.constant 0 : index
    %c0_5 = arith.constant 0 : index
    %12 = vector.load %arg3[%c0_4, %c0_5] : memref<1x1024xf32, #tpu.memory_space<vmem>>, vector<1x1024xf32>
    tpu.vector_store %arg3[%c0_4, %c0_5], %4 {strides = array<i32>} : memref<1x1024xf32, #tpu.memory_space<vmem>>, vector<1x1024xf32>,
    %13 = math.sqrt %11 : vector<1x1024xf32>
    %c0_6 = arith.constant 0 : index
    %c0_7 = arith.constant 0 : index
    %14 = vector.load %arg4[%c0_6, %c0_7] : memref<1x1024xf32, #tpu.memory_space<vmem>>, vector<1x1024xf32>
    tpu.vector_store %arg4[%c0_6, %c0_7], %13 {strides = array<i32>} : memref<1x1024xf32, #tpu.memory_space<vmem>>, vector<1x1024xf32>,
    return
  }
  func.func @transform_0(%arg0: i32, %arg1: i32) -> (i32, i32) {
    %c0_i32 = arith.constant 0 : i32
    return %arg1, %arg0 : i32, i32
  }
  func.func @transform_1(%arg0: i32, %arg1: i32) -> (i32, i32) {
    %c0_i32 = arith.constant 0 : i32
    %c0_i32_0 = arith.constant 0 : i32
    return %c0_i32, %arg0 : i32, i32
  }
  func.func @transform_2(%arg0: i32, %arg1: i32) -> (i32, i32) {
    %c0_i32 = arith.constant 0 : i32
    %c0_i32_0 = arith.constant 0 : i32
    return %c0_i32, %arg0 : i32, i32
  }
}

</mosaic_0001>

<bundles_post_ra>
// kernel: tpu_custom_call.1
= control target key start
LH: loop header
LB: loop body
LE: loop exit
PB: predicated region body
PF: predicated region fallthrough
CT: control target
= control target key end

     0   :  { %8 = vsyncpa [#allocation3], 0  ;;  %s708_s0 = inlined_call_operand.hbm [shape: f32[2,1024], index: 0, kind: input, shape index: {}]   ;;  %s709_s1 = inlined_call_operand.hbm [shape: f32[1,1024], index: 1, kind: output, shape index: {0}]   ;;  %s710_s2 = inlined_call_operand.hbm [shape: f32[1,1024], index: 2, kind: output, shape index: {1}]  }
   0x1   :  { %9 = vsyncpa [#allocation4], 0 }
   0x2   :  { %10 = vsyncpa [#allocation7], 0  ;;  %s563_s9 = smov [#allocation2]  }
   0x3   :  { %s17_s10 = sshll.u32 %s563_s9, 4  ;;  %s18_s10 = int_to_ptr.vmem [resolvable:$true] %s17_s10 }
   0x4   :  { %s505_s11 = scalar_lea.vmem %s18_s10, 256  ;;  %p510_p1 = scmp.lt.s32.totalorder %s18_s10, %s18_s10 }
   0x5   :  { %p506_p0 = scmp.ne.s32.totalorder %s18_s10, %s505_s11  ;;  %p511_p2 = scmp.lt.s32.totalorder %s505_s11, %s505_s11 }
   0x7   :  { %p512_p3 = por %p511_p2, %p510_p1 }
   0x9   :  { %p513_p4 = pnand %p512_p3, %p506_p0 }
   0xb   :  { %516 = shalt.err (!%p513_p4)
}
   0xc   :  { %20 = dma.hbm_to_vmem [thread:$0]  %s708_s0, 256, %s18_s10, [#allocation3]  }
   0xd   :  { %557 = dma.done.wait [#allocation3], 256  }
   0xe   :  { %558 = vsyncadd [#allocation3], 4294967040  ;;  %v32_v0 = vlaneseq  ;;  %v564_v1 = vmov 1983009808   ;;  %v591_v6 = vld [vmem:[#allocation2] sm:$0xff]  ;;  %v593_v7 = vld [vmem:[#allocation2 + $0x8] sm:$0xff] }
   0xf   :  { %v30_v2 = vunpack.c.l.s4 %v564_v1  ;;  %vm70_vm0 = vcmask 1041408   ;;  %v565_v8 = vmov 1966171168   ;;  %v28_v10 = vcombine.high %v591_v6, %v591_v6  ;;  %s566_s0 = smov [#allocation5]  }
  0x10   :  { %v586_v3 = vshrl.u32 %v32_v0, 7  ;;  %v595_v9 = vunpack.c.l.s4 %v565_v8  ;;  %v45_v12 = vcombine.high %v593_v7, %v593_v7  ;;  %s451_s14 = sshll.u32 %s566_s0, 4  ;;  %s452_s14 = int_to_ptr.vmem [resolvable:$true] %s451_s14 }
  0x11   :  { %v31_v4 = vunpack.c.0.s8 %v30_v2  ;;  %s517_s15 = scalar_lea.vmem %s452_s14, 128  ;;  %p522_p6 = scmp.lt.s32.totalorder %s452_s14, %s452_s14 }
  0x12   :  { %v285_v20 = vunpack.c.0.s8 %v595_v9  ;;  %p518_p5 = scmp.ne.s32.totalorder %s452_s14, %s517_s15  ;;  %p523_p7 = scmp.lt.s32.totalorder %s517_s15, %s517_s15 }
  0x13   :  { %v589_v5 = vsub.s32 %v31_v4, %v586_v3 }
  0x14   :  { %p524_p8 = por %p523_p7, %p522_p6 }
  0x15   :  { %v35_v11 = vrot.slane %v591_v6, %v589_v5  ;;  %v52_v13 = vrot.slane %v593_v7, %v589_v5  ;;  %v42_v14 = vrot.slane %v28_v10, %v589_v5  ;;  %v59_v16 = vrot.slane %v45_v12, %v589_v5 }
  0x16   :  { %p525_p9 = pnand %p524_p8, %p518_p5 }
  0x17   :  { %v43_v15 = vcombine.high %v35_v11, %v35_v11  ;;  %v60_v17 = vcombine.high %v52_v13, %v52_v13  ;;  %v71_v18 = vsel %vm70_vm0, %v35_v11, 0.0  ;;  %v99_v19 = vsel %vm70_vm0, %v52_v13, 0.0 }
  0x18   :  { %v44_v21 = vcombine.high %v42_v14, %v42_v14  ;;  %v61_v22 = vcombine.high %v59_v16, %v59_v16  ;;  %v72_v23 = vrot.slane %v71_v18, 4  ;;  %v85_v26 = vsel %vm70_vm0, %v42_v14, 0.0 }
  0x19   :  { %v78_v24 = vsel %vm70_vm0, %v43_v15, 0.0  ;;  %v100_v27 = vrot.slane %v99_v19, 4  ;;  %v106_v28 = vsel %vm70_vm0, %v60_v17, 0.0  ;;  %v86_v30 = vrot.slane %v85_v26, 4 }
  0x1a   :  { %v79_v25 = vrot.slane %v78_v24, 4  ;;  %v73_v29 = vadd.f32 %v72_v23, %v71_v18  ;;  %v92_v31 = vsel %vm70_vm0, %v44_v21, 0.0  ;;  %v107_v32 = vrot.slane %v106_v28, 4 }
  0x1b   :  { %v93_v34 = vrot.slane %v92_v31, 4  ;;  %v101_v35 = vadd.f32 %v100_v27, %v99_v19  ;;  %v113_v36 = vsel %vm70_vm0, %v59_v16, 0.0  ;;  %v87_v38 = vadd.f32 %v86_v30, %v85_v26 }
  0x1c   :  { %v80_v33 = vadd.f32 %v79_v25, %v78_v24  ;;  %v74_v37 = vrot.slane %v73_v29, 2  ;;  %v108_v39 = vadd.f32 %v107_v32, %v106_v28  ;;  %v114_v40 = vrot.slane %v113_v36, 4 }
  0x1d   :  { %v94_v42 = vadd.f32 %v93_v34, %v92_v31  ;;  %v102_v43 = vrot.slane %v101_v35, 2  ;;  %v120_v44 = vsel %vm70_vm0, %v61_v22, 0.0  ;;  %v88_v46 = vrot.slane %v87_v38, 2 }
  0x1e   :  { %v81_v41 = vrot.slane %v80_v33, 2  ;;  %v75_v45 = vadd.f32 %v74_v37, %v73_v29  ;;  %v109_v47 = vrot.slane %v108_v39, 2  ;;  %v115_v48 = vadd.f32 %v114_v40, %v113_v36 }
  0x1f   :  { %v95_v50 = vrot.slane %v94_v42, 2  ;;  %v103_v51 = vadd.f32 %v102_v43, %v101_v35  ;;  %v121_v52 = vrot.slane %v120_v44, 4  ;;  %v89_v54 = vadd.f32 %v88_v46, %v87_v38 }
  0x20   :  { %v82_v49 = vadd.f32 %v81_v41, %v80_v33  ;;  %v76_v53 = vrot.slane %v75_v45, 1  ;;  %v110_v55 = vadd.f32 %v109_v47, %v108_v39  ;;  %v116_v56 = vrot.slane %v115_v48, 2 }
  0x21   :  { %v96_v58 = vadd.f32 %v95_v50, %v94_v42  ;;  %v104_v59 = vrot.slane %v103_v51, 1  ;;  %v122_v60 = vadd.f32 %v121_v52, %v120_v44  ;;  %v90_v62 = vrot.slane %v89_v54, 1 }
  0x22   :  { %v83_v57 = vrot.slane %v82_v49, 1  ;;  %v77_v61 = vadd.f32 %v76_v53, %v75_v45  ;;  %v111_v63 = vrot.slane %v110_v55, 1  ;;  %v117_v0 = vadd.f32 %v116_v56, %v115_v48 }
  0x23   :  { %v97_v2 = vrot.slane %v96_v58, 1  ;;  %v105_v4 = vadd.f32 %v104_v59, %v103_v51  ;;  %v123_v8 = vrot.slane %v122_v60, 2  ;;  %v91_v9 = vadd.f32 %v90_v62, %v89_v54 }
  0x24   :  { %v84_v1 = vadd.f32 %v83_v57, %v82_v49  ;;  %v112_v10 = vadd.f32 %v111_v63, %v110_v55  ;;  %v118_v11 = vrot.slane %v117_v0, 1  ;;  %v127_v12 = vmul.f32 0.5, %v77_v61 }
  0x25   :  { %v98_v13 = vadd.f32 %v97_v2, %v96_v58  ;;  %v124_v14 = vadd.f32 %v123_v8, %v122_v60  ;;  %v131_v16 = vmul.f32 0.5, %v105_v4  ;;  %v129_v18 = vmul.f32 0.5, %v91_v9 }
  0x26   :  { %v128_v15 = vmul.f32 0.5, %v84_v1  ;;  %v119_v17 = vadd.f32 %v118_v11, %v117_v0  ;;  %v132_v19 = vmul.f32 0.5, %v112_v10  ;;  %v617_v21 = vsub.s32 %v285_v20, %v586_v3 }
  0x27   :  { %v125_v22 = vrot.slane %v124_v14, 1  ;;  %v130_v23 = vmul.f32 0.5, %v98_v13 }
  0x28   :  { %v143_v24 = vcombine.low %v127_v12, %v128_v15  ;;  %v133_v25 = vmul.f32 0.5, %v119_v17  ;;  %v160_v29 = vcombine.low %v131_v16, %v132_v19 }
  0x29   :  { %v126_v26 = vadd.f32 %v125_v22, %v124_v14  ;;  %v144_v27 = vcombine.low %v129_v18, %v130_v23 }
  0x2a   :  { %v151_v28 = vrot.slane %v143_v24, %v589_v5  ;;  %v289_v30 = vrot.slane %v143_v24, %v617_v21  ;;  %v168_v3 = vrot.slane %v160_v29, %v589_v5  ;;  %v303_v20 = vrot.slane %v160_v29, %v617_v21 }
  0x2b   :  { %v134_v31 = vmul.f32 0.5, %v126_v26  ;;  %v158_v32 = vrot.slane %v144_v27, %v589_v5  ;;  %v296_v33 = vrot.slane %v144_v27, %v617_v21 }
  0x2d   :  { %v159_v34 = vcombine.low %v151_v28, %v158_v32  ;;  %v161_v35 = vcombine.low %v133_v25, %v134_v31  ;;  %v311_v36 = vcombine.low %v289_v30, %v296_v33 }
  0x2f   :  { %v175_v37 = vrot.slane %v161_v35, %v589_v5  ;;  %v179_v38 = vsub.f32 %v591_v6, %v159_v34  ;;  %v310_v39 = vrot.slane %v161_v35, %v617_v21  ;;  %v319_v43 = vrot.slane %v311_v36, %v617_v21 }
  0x31   :  { %v176_v40 = vcombine.low %v168_v3, %v175_v37  ;;  %v181_v41 = vmul.f32 %v179_v38, %v179_v38  ;;  %v312_v42 = vcombine.low %v303_v20, %v310_v39 }
  0x33   :  { %v180_v44 = vsub.f32 %v593_v7, %v176_v40  ;;  %v185_v45 = vcombine.high %v181_v41, %v181_v41  ;;  %v192_v46 = vrot.slane %v181_v41, %v589_v5  ;;  %v326_v47 = vrot.slane %v312_v42, %v617_v21 }
  0x35   :  { %v182_v48 = vmul.f32 %v180_v44, %v180_v44  ;;  %v199_v49 = vrot.slane %v185_v45, %v589_v5  ;;  %v200_v6 = vcombine.high %v192_v46, %v192_v46  ;;  %v227_v50 = vsel %vm70_vm0, %v192_v46, 0.0 }
  0x36   :  { %v228_v51 = vrot.slane %v227_v50, 4  ;;  %v327_v52 = vcombine.low %v319_v43, %v326_v47 }
  0x37   :  { %v201_v53 = vcombine.high %v199_v49, %v199_v49  ;;  %v202_v54 = vcombine.high %v182_v48, %v182_v48  ;;  %v209_v7 = vrot.slane %v182_v48, %v589_v5  ;;  %v234_v55 = vsel %vm70_vm0, %v200_v6, 0.0 }
  0x38   :  { %v229_v56 = vadd.f32 %v228_v51, %v227_v50  ;;  %v235_v57 = vrot.slane %v234_v55, 4  ;;  %v241_v58 = vsel %vm70_vm0, %v199_v49, 0.0  ;;  %329 = vst [vmem:[#allocation5] sm:$0xff] %v327_v52 }
  0x39   :  { %v216_v59 = vrot.slane %v202_v54, %v589_v5  ;;  %v217_v60 = vcombine.high %v209_v7, %v209_v7  ;;  %v242_v61 = vrot.slane %v241_v58, 4  ;;  %v248_v62 = vsel %vm70_vm0, %v201_v53, 0.0 }
  0x3a   :  { %528 = shalt.err (!%p525_p9)
}
  0x3b   :  { %454 = dma.vmem_to_hbm [thread:$0]  %s452_s14, 128, %s709_s1, [#allocation4]   ;;  %v230_v63 = vrot.slane %v229_v56, 2  ;;  %v236_v0 = vadd.f32 %v235_v57, %v234_v55  ;;  %v249_v1 = vrot.slane %v248_v62, 4  ;;  %v255_v5 = vsel %vm70_vm0, %v209_v7, 0.0 }
  0x3c   :  { %v218_v2 = vcombine.high %v216_v59, %v216_v59  ;;  %v243_v4 = vadd.f32 %v242_v61, %v241_v58  ;;  %v256_v8 = vrot.slane %v255_v5, 4  ;;  %v262_v9 = vsel %vm70_vm0, %v217_v60, 0.0  ;;  %s567_s1 = smov [#allocation6]  }
  0x3d   :  { %v231_v10 = vadd.f32 %v230_v63, %v229_v56  ;;  %v237_v11 = vrot.slane %v236_v0, 2  ;;  %v250_v12 = vadd.f32 %v249_v1, %v248_v62  ;;  %v263_v13 = vrot.slane %v262_v9, 4  ;;  %s461_s18 = sshll.u32 %s567_s1, 4  ;;  %s462_s18 = int_to_ptr.vmem [resolvable:$true] %s461_s18 }
  0x3e   :  { %v244_v14 = vrot.slane %v243_v4, 2  ;;  %v257_v15 = vadd.f32 %v256_v8, %v255_v5  ;;  %v269_v16 = vsel %vm70_vm0, %v216_v59, 0.0  ;;  %v276_v17 = vsel %vm70_vm0, %v218_v2, 0.0  ;;  %s537_s19 = scalar_lea.vmem %s462_s18, 128  ;;  %p542_p11 = scmp.lt.s32.totalorder %s462_s18, %s462_s18 }
  0x3f   :  { %v232_v18 = vrot.slane %v231_v10, 1  ;;  %v238_v19 = vadd.f32 %v237_v11, %v236_v0  ;;  %v251_v22 = vrot.slane %v250_v12, 2  ;;  %v264_v23 = vadd.f32 %v263_v13, %v262_v9  ;;  %p538_p10 = scmp.ne.s32.totalorder %s462_s18, %s537_s19  ;;  %p543_p12 = scmp.lt.s32.totalorder %s537_s19, %s537_s19 }
  0x40   :  { %v245_v24 = vadd.f32 %v244_v14, %v243_v4  ;;  %v258_v25 = vrot.slane %v257_v15, 2  ;;  %v270_v26 = vrot.slane %v269_v16, 4  ;;  %v277_v27 = vrot.slane %v276_v17, 4 }
  0x41   :  { %v233_v28 = vadd.f32 %v232_v18, %v231_v10  ;;  %v239_v29 = vrot.slane %v238_v19, 1  ;;  %v252_v30 = vadd.f32 %v251_v22, %v250_v12  ;;  %v265_v31 = vrot.slane %v264_v23, 2  ;;  %p544_p13 = por %p543_p12, %p542_p11 }
  0x42   :  { %v246_v32 = vrot.slane %v245_v24, 1  ;;  %v259_v33 = vadd.f32 %v258_v25, %v257_v15  ;;  %v271_v34 = vadd.f32 %v270_v26, %v269_v16  ;;  %v278_v35 = vadd.f32 %v277_v27, %v276_v17 }
  0x43   :  { %v240_v3 = vadd.f32 %v239_v29, %v238_v19  ;;  %v253_v20 = vrot.slane %v252_v30, 1  ;;  %v266_v36 = vadd.f32 %v265_v31, %v264_v23  ;;  %481 = vrsqrt.f32 %v233_v28  ;;  %p545_p0 = pnand %p544_p13, %p538_p10 }
  0x44   :  { %v247_v37 = vadd.f32 %v246_v32, %v245_v24  ;;  %v260_v38 = vrot.slane %v259_v33, 1  ;;  %v272_v39 = vrot.slane %v271_v34, 2  ;;  %v279_v40 = vrot.slane %v278_v35, 2 }
  0x45   :  { %v254_v41 = vadd.f32 %v253_v20, %v252_v30  ;;  %v267_v42 = vrot.slane %v266_v36, 1  ;;  %483 = vrsqrt.f32 %v240_v3  ;;  %vm332_vm1 = vcmp.eq.f32.partialorder %v233_v28, inf }
  0x46   :  { %v273_v43 = vadd.f32 %v272_v39, %v271_v34  ;;  %v280_v44 = vadd.f32 %v279_v40, %v278_v35  ;;  %v646_v45 = vadd.f32 %v260_v38, %v259_v33  ;;  %485 = vrsqrt.f32 %v247_v37 }
  0x47   :  { %v648_v46 = vadd.f32 %v267_v42, %v266_v36  ;;  %487 = vrsqrt.f32 %v254_v41  ;;  %vm334_vm2 = vcmp.eq.f32.partialorder %v233_v28, 0.0  ;;  %v335_v52 = vand.u32 2147483648, %v233_v28 }
  0x48   :  { %v274_v47 = vrot.slane %v273_v43, 1  ;;  %v281_v48 = vrot.slane %v280_v44, 1  ;;  %489 = vrsqrt.f32 %v646_v45  ;;  %vm339_vm3 = vcmp.eq.f32.partialorder %v240_v3, inf }
  0x49   :  { %491 = vrsqrt.f32 %v648_v46  ;;  %vm341_vm4 = vcmp.eq.f32.partialorder %v240_v3, 0.0  ;;  %v342_v54 = vand.u32 2147483648, %v240_v3  ;;  %vm346_vm5 = vcmp.eq.f32.partialorder %v247_v37, inf }
  0x4a   :  { %v650_v49 = vadd.f32 %v274_v47, %v273_v43  ;;  %v652_v6 = vadd.f32 %v281_v48, %v280_v44  ;;  %vm348_vm6 = vcmp.eq.f32.partialorder %v247_v37, 0.0  ;;  %v349_v55 = vand.u32 2147483648, %v247_v37 }
  0x4b   :  { %vm353_vm7 = vcmp.eq.f32.partialorder %v254_v41, inf  ;;  %vm355_vm8 = vcmp.eq.f32.partialorder %v254_v41, 0.0  ;;  %v356_v56 = vand.u32 2147483648, %v254_v41  ;;  %vm360_vm9 = vcmp.eq.f32.partialorder %v646_v45, inf }
  0x4c   :  { %493 = vrsqrt.f32 %v650_v49  ;;  %vm362_vm10 = vcmp.eq.f32.partialorder %v646_v45, 0.0  ;;  %v363_v59 = vand.u32 2147483648, %v646_v45  ;;  %vm367_vm11 = vcmp.eq.f32.partialorder %v648_v46, inf }
  0x4d   :  { %495 = vrsqrt.f32 %v652_v6  ;;  %vm369_vm12 = vcmp.eq.f32.partialorder %v648_v46, 0.0  ;;  %v370_v1 = vand.u32 2147483648, %v648_v46  ;;  %vm374_vm13 = vcmp.eq.f32.partialorder %v650_v49, inf }
  0x4e   :  { %vm376_vm14 = vcmp.eq.f32.partialorder %v650_v49, 0.0  ;;  %v377_v8 = vand.u32 2147483648, %v650_v49  ;;  %vm381_vm15 = vcmp.eq.f32.partialorder %v652_v6, inf  ;;  %vm383_vm0 = vcmp.eq.f32.partialorder %v652_v6, 0.0 }
  0x4f   :  { %v384_v22 = vand.u32 2147483648, %v652_v6 }
  0x50   :  { %v482_v50 = vpop.eup %481 }
  0x51   :  { %v331_v51 = vmul.f32 %v482_v50, %v233_v28 }
  0x52   :  { %v484_v7 = vpop.eup %483 }
  0x53   :  { %v333_v53 = vsel %vm332_vm1, %v233_v28, %v331_v51  ;;  %v486_v57 = vpop.eup %485  ;;  %v338_v58 = vmul.f32 %v484_v7, %v240_v3 }
  0x54   :  { %v488_v60 = vpop.eup %487  ;;  %v336_v61 = vsel %vm334_vm2, %v335_v52, %v333_v53  ;;  %v345_v62 = vmul.f32 %v486_v57, %v247_v37 }
  0x55   :  { %v340_v63 = vsel %vm339_vm3, %v240_v3, %v338_v58  ;;  %v352_v0 = vmul.f32 %v488_v60, %v254_v41  ;;  %v490_v5 = vpop.eup %489 }
  0x56   :  { %v343_v2 = vsel %vm341_vm4, %v342_v54, %v340_v63  ;;  %v347_v4 = vsel %vm346_vm5, %v247_v37, %v345_v62  ;;  %v492_v9 = vpop.eup %491  ;;  %v359_v12 = vmul.f32 %v490_v5, %v646_v45 }
  0x57   :  { %v350_v10 = vsel %vm348_vm6, %v349_v55, %v347_v4  ;;  %v354_v11 = vsel %vm353_vm7, %v254_v41, %v352_v0  ;;  %v394_v13 = vcombine.low %v336_v61, %v343_v2  ;;  %v366_v16 = vmul.f32 %v492_v9, %v648_v46 }
  0x58   :  { %v357_v15 = vsel %vm355_vm8, %v356_v56, %v354_v11  ;;  %v361_v18 = vsel %vm360_vm9, %v646_v45, %v359_v12 }
  0x59   :  { %v494_v14 = vpop.eup %493  ;;  %v395_v23 = vcombine.low %v350_v10, %v357_v15  ;;  %v364_v24 = vsel %vm362_vm10, %v363_v59, %v361_v18  ;;  %v368_v25 = vsel %vm367_vm11, %v648_v46, %v366_v16  ;;  %v404_v27 = vrot.slane %v394_v13, %v617_v21 }
  0x5a   :  { %v496_v17 = vpop.eup %495  ;;  %v373_v19 = vmul.f32 %v494_v14, %v650_v49  ;;  %v371_v28 = vsel %vm369_vm12, %v370_v1, %v368_v25 }
  0x5b   :  { %v380_v26 = vmul.f32 %v496_v17, %v652_v6  ;;  %v411_v30 = vrot.slane %v395_v23, %v617_v21  ;;  %v396_v33 = vcombine.low %v364_v24, %v371_v28 }
  0x5c   :  { %v375_v29 = vsel %vm374_vm13, %v650_v49, %v373_v19 }
  0x5d   :  { %v378_v31 = vsel %vm376_vm14, %v377_v8, %v375_v29  ;;  %v382_v32 = vsel %vm381_vm15, %v652_v6, %v380_v26  ;;  %v418_v3 = vrot.slane %v396_v33, %v617_v21  ;;  %v426_v20 = vcombine.low %v404_v27, %v411_v30 }
  0x5e   :  { %v385_v34 = vsel %vm383_vm0, %v384_v22, %v382_v32 }
  0x5f   :  { %v397_v35 = vcombine.low %v378_v31, %v385_v34  ;;  %v434_v38 = vrot.slane %v426_v20, %v617_v21 }
  0x61   :  { %v425_v36 = vrot.slane %v397_v35, %v617_v21 }
  0x63   :  { %v427_v37 = vcombine.low %v418_v3, %v425_v36 }
  0x65   :  { %v441_v39 = vrot.slane %v427_v37, %v617_v21 }
  0x67   :  { %v442_v40 = vcombine.low %v434_v38, %v441_v39 }
  0x69   :  { %444 = vst [vmem:[#allocation6] sm:$0xff] %v442_v40 }
  0x6a   :  { %548 = shalt.err (!%p545_p0)
}
  0x6b   :  { %464 = dma.vmem_to_hbm [thread:$0]  %s462_s18, 128, %s710_s2, [#allocation7]  }
  0x6c   :  { %559 = dma.done.wait [#allocation4], 128  }
  0x6d   :  { %560 = vsyncadd [#allocation4], 4294967168 }
  0x6e   :  { %561 = dma.done.wait [#allocation7], 128  }
  0x6f   :  { %562 = vsyncadd [#allocation7], 4294967168 }
  0x70   :  { %471 = vsyncpa [#allocation3], 1 }
  0x71   :  { %472 = vsyncpa [#allocation4], 1 }
  0x72   :  { %473 = vsyncpa [#allocation7], 1 }

</bundles_post_ra>
